<compile_context>
chip_gen: v7x
topology: tpu7x:2x2x1
jax: 0.10.0
libtpu: 0.0.40
codegen_flags: <defaults>
</compile_context>

<pallas_src>
import functools

import jax
import jax.numpy as jnp
from jax.experimental import pallas as pl
from jax.experimental.pallas import tpu as pltpu


def _round_up(x: int, m: int) -> int:
    return ((x + m - 1) // m) * m


def _sublane_multiple(dtype) -> int:
    # bf16 vregs pack [16,128]; 1-byte types pack [32,128].
    return {4: 8, 2: 16, 1: 32}.get(jnp.dtype(dtype).itemsize, 8)


def _choose_tile(dim_padded: int, align: int, max_tile: int) -> int:
    """Largest multiple of `align` that divides `dim_padded` and is <= max_tile."""
    units = dim_padded // align
    max_units = max(1, min(units, max_tile // align))
    for u in range(max_units, 0, -1):
        if units % u == 0:
            return u * align
    return align


def _vmem_capacity_bytes() -> int:
    try:
        return int(pltpu.get_tpu_info().vmem_capacity_bytes)
    except Exception:
        return 64 * 1024 * 1024  # conservative: v7x has 64 MiB per TensorCore


# ---------------------------------------------------------------------------
# Kernels
# ---------------------------------------------------------------------------
def _linear_kernel_f32out(x_ref, w_ref, b_ref, o_ref):
    """f32 output: accumulate directly into the K-resident output block.

    x_ref: (TM, TK)  w_ref: (TK, TN)  b_ref: (1, TN)  o_ref: (TM, TN) f32
    """
    k = pl.program_id(2)

    @pl.when(k == 0)
    def _():
        o_ref[...] = jnp.zeros_like(o_ref)

    o_ref[...] += jnp.dot(x_ref[...], w_ref[...], preferred_element_type=jnp.float32)

    @pl.when(k == pl.num_programs(2) - 1)
    def _():
        o_ref[...] += b_ref[...].astype(jnp.float32)


def _linear_kernel_acc(x_ref, w_ref, b_ref, o_ref, acc_ref):
    """Non-f32 output: f32 VMEM accumulator, cast on the final K step."""
    k = pl.program_id(2)

    @pl.when(k == 0)
    def _():
        acc_ref[...] = jnp.zeros_like(acc_ref)

    acc_ref[...] += jnp.dot(x_ref[...], w_ref[...], preferred_element_type=jnp.float32)

    @pl.when(k == pl.num_programs(2) - 1)
    def _():
        o_ref[...] = (acc_ref[...] + b_ref[...].astype(jnp.float32)).astype(o_ref.dtype)


# ---------------------------------------------------------------------------
# One-time parameter preparation (outside the per-step jit)
# ---------------------------------------------------------------------------
def prepare_linear_params(weight, bias, compute_dtype=None):
    """Transpose W [D_out,D_in] -> [D_in,D_out], pad both dims to 128, pad bias.

    Do this ONCE at parameter-init time; the per-call forward only pads x.
    """
    d_out, d_in = weight.shape
    kp = _round_up(d_in, 128)
    np_ = _round_up(d_out, 128)

    w_t = weight.T  # [D_in, D_out] -> plain row-major contraction in the kernel
    if (kp, np_) != w_t.shape:
        w_t = jnp.pad(w_t, ((0, kp - d_in), (0, np_ - d_out)))
    if compute_dtype is not None:
        w_t = w_t.astype(compute_dtype)

    b2d = bias if np_ == d_out else jnp.pad(bias, (0, np_ - d_out))
    b2d = b2d.reshape(1, np_)  # bias add stays in its original (f32) dtype
    return w_t, b2d


# ---------------------------------------------------------------------------
# Forward
# ---------------------------------------------------------------------------
@functools.partial(jax.jit, static_argnames=("d_out", "compute_dtype"))
def linear_forward(x, w_t_padded, bias_padded, *, d_out, compute_dtype=None):
    """x: [B, D_in] (unpadded). w_t_padded: [Kp, Np] from prepare_linear_params.
    bias_padded: [1, Np]. Returns [B, d_out] in x.dtype."""
    B, d_in = x.shape
    Kp, Np = w_t_padded.shape
    out_dtype = x.dtype

    cdt = jnp.dtype(compute_dtype) if compute_dtype is not None else jnp.dtype(x.dtype)
    cd_size = cdt.itemsize
    sub = _sublane_multiple(cdt)

    # Only x is padded per call (zeros in K contribute nothing to the dot).
    Bp = _round_up(B, sub)
    if (Bp, Kp) != (B, d_in):
        x = jnp.pad(x, ((0, Bp - B), (0, Kp - d_in)))
    if compute_dtype is not None:
        x = x.astype(compute_dtype)
        w_t_padded = w_t_padded.astype(compute_dtype)  # no-op if prepared cast

    # --- Tile selection: divisors of the (minimally) padded dims ---
    big_vmem = _vmem_capacity_bytes() >= 100 * 1024 * 1024  # v5e / v6e: 128 MiB
    if cd_size >= 4:
        tm_max, tn_max, tk_max = 512, (1024 if big_vmem else 512), 1024
    else:
        tm_max, tn_max, tk_max = 512, (2048 if big_vmem else 1024), 2048

    tm = _choose_tile(Bp, sub, tm_max)
    tk = _choose_tile(Kp, 128, tk_max)
    grid_m = Bp // tm
    if grid_m == 1 and Np // 128 >= 2:
        # GEMV-shaped problem: keep >=2 N tiles so both v7x TCs get work.
        tn = _choose_tile(Np, 128, min(tn_max, max(128, Np // 2)))
    else:
        tn = _choose_tile(Np, 128, tn_max)

    grid = (Bp // tm, Np // tn, Kp // tk)

    f32_out = out_dtype == jnp.dtype(jnp.float32)
    kernel = _linear_kernel_f32out if f32_out else _linear_kernel_acc
    scratch = [] if f32_out else [pltpu.VMEM((tm, tn), jnp.float32)]

    out_size = jnp.dtype(out_dtype).itemsize
    b_size = bias_padded.dtype.itemsize
    # Double-buffered x/W/bias/out tiles (+ optional f32 accumulator) + margin.
    need = 2 * (tm * tk * cd_size + tk * tn * cd_size + tn * b_size + tm * tn * out_size)
    if not f32_out:
        need += tm * tn * 4
    vmem_limit = int(min(max(need + (8 << 20), 32 << 20), 56 << 20))

    flops = 2 * Bp * Kp * Np
    bytes_accessed = (
        grid[1] * Bp * Kp * cd_size      # x streamed once per N-tile column
        + grid[0] * Kp * Np * cd_size    # W streamed once per M-tile row
        + Np * b_size
        + Bp * Np * out_size
    )

    out_p = pl.pallas_call(
        kernel,
        out_shape=jax.ShapeDtypeStruct((Bp, Np), out_dtype),
        grid_spec=pltpu.PrefetchScalarGridSpec(
            num_scalar_prefetch=0,
            grid=grid,
            in_specs=[
                pl.BlockSpec((tm, tk), lambda i, j, k: (i, k)),  # x tile
                pl.BlockSpec((tk, tn), lambda i, j, k: (k, j)),  # W^T tile (pre-transposed)
                pl.BlockSpec((1, tn), lambda i, j, k: (0, j)),   # bias tile
            ],
            out_specs=pl.BlockSpec((tm, tn), lambda i, j, k: (i, j)),
            scratch_shapes=scratch,
        ),
        compiler_params=pltpu.CompilerParams(
            dimension_semantics=("parallel", "parallel", "arbitrary"),
            vmem_limit_bytes=vmem_limit,
        ),
        cost_estimate=pl.CostEstimate(
            flops=flops, transcendentals=0, bytes_accessed=bytes_accessed
        ),
    )(x, w_t_padded, bias_padded)

    if Bp != B or Np != d_out:
        out_p = out_p[:B, :d_out]
    return out_p


if __name__ == "__main__":
    # Small shapes consistent with nn.Linear(input_dim, output_dim).
    batch, input_dim, output_dim = 8, 32, 16

    key = jax.random.PRNGKey(0)
    kx, kw, kb = jax.random.split(key, 3)

    x = jax.random.normal(kx, (batch, input_dim), dtype=jnp.float32)
    # PyTorch-style uniform init with bound 1/sqrt(fan_in).
    bound = 1.0 / jnp.sqrt(jnp.float32(input_dim))
    weight = jax.random.uniform(
        kw, (output_dim, input_dim), dtype=jnp.float32, minval=-bound, maxval=bound
    )
    bias = jax.random.uniform(
        kb, (output_dim,), dtype=jnp.float32, minval=-bound, maxval=bound
    )

    # One-time parameter prep (transpose + pad) happens OUTSIDE the jitted forward.
    w_t, b2d = prepare_linear_params(weight, bias)

    out = linear_forward(x, w_t, b2d, d_out=output_dim)
    out = jax.block_until_ready(out)

    # Reference check in plain JAX (default f32 path must match tightly).
    ref = x @ weight.T + bias
    assert out.shape == (batch, output_dim)
    assert jnp.allclose(out, ref, atol=1e-5, rtol=1e-5), "mismatch vs reference"

    print("KERNEL_OK")
</pallas_src>

<mosaic_0001>
module attributes {stable_mosaic.version = 11 : i64} {
  func.func @_linear_kernel_f32out(%arg0: i32, %arg1: i32, %arg2: i32, %arg3: memref<8x128xf32, #tpu.memory_space<vmem>>, %arg4: memref<128x128xf32, #tpu.memory_space<vmem>>, %arg5: memref<1x128xf32, #tpu.memory_space<vmem>>, %arg6: memref<8x128xf32, #tpu.memory_space<vmem>>) attributes {dimension_semantics = [#tpu.dimension_semantics<parallel>, #tpu.dimension_semantics<parallel>, #tpu.dimension_semantics<arbitrary>], iteration_bounds = array<i64: 1, 1, 1>, scalar_prefetch = 0 : i64, scratch_operands = 0 : i64, tpu.core_type = #tpu.core_type<tc>, window_params = [{transform_indices = @transform_0, window_bounds = array<i64: 8, 128>}, {transform_indices = @transform_1, window_bounds = array<i64: 128, 128>}, {transform_indices = @transform_2, window_bounds = array<i64: 1, 128>}, {transform_indices = @transform_3, window_bounds = array<i64: 8, 128>}]} {
    %c0_i32 = arith.constant 0 : i32
    %0 = arith.cmpi eq, %arg2, %c0_i32 : i32
    %1 = arith.extui %0 : i1 to i32
    %c0_i32_0 = arith.constant 0 : i32
    %2 = arith.cmpi ne, %1, %c0_i32_0 : i32
    scf.if %2 {
      %cst_10 = arith.constant 0.000000e+00 : f32
      %12 = vector.broadcast %cst_10 : f32 to vector<8x128xf32>
      %c0_11 = arith.constant 0 : index
      %c0_12 = arith.constant 0 : index
      %13 = vector.load %arg6[%c0_11, %c0_12] : memref<8x128xf32, #tpu.memory_space<vmem>>, vector<8x128xf32>
      tpu.vector_store %arg6[%c0_11, %c0_12], %12 {strides = array<i32>} : memref<8x128xf32, #tpu.memory_space<vmem>>, vector<8x128xf32>,
    } else {
    }
    %c0 = arith.constant 0 : index
    %c0_1 = arith.constant 0 : index
    %3 = vector.load %arg6[%c0, %c0_1] : memref<8x128xf32, #tpu.memory_space<vmem>>, vector<8x128xf32>
    %c0_2 = arith.constant 0 : index
    %c0_3 = arith.constant 0 : index
    %4 = vector.load %arg3[%c0_2, %c0_3] : memref<8x128xf32, #tpu.memory_space<vmem>>, vector<8x128xf32>
    %c0_4 = arith.constant 0 : index
    %c0_5 = arith.constant 0 : index
    %5 = vector.load %arg4[%c0_4, %c0_5] : memref<128x128xf32, #tpu.memory_space<vmem>>, vector<128x128xf32>
    %cst = arith.constant dense<0.000000e+00> : vector<8x128xf32>
    %6 = tpu.matmul %4, %5, %cst {dimension_numbers = #tpu.dot_dimension_numbers<[1], [0], [0], [1], [0, 0, 1, 1], [], []>} : vector<8x128xf32>, vector<128x128xf32>, vector<8x128xf32> -> vector<8x128xf32>
    %7 = arith.addf %3, %6 : vector<8x128xf32>
    %c0_6 = arith.constant 0 : index
    %c0_7 = arith.constant 0 : index
    %8 = vector.load %arg6[%c0_6, %c0_7] : memref<8x128xf32, #tpu.memory_space<vmem>>, vector<8x128xf32>
    tpu.vector_store %arg6[%c0_6, %c0_7], %7 {strides = array<i32>} : memref<8x128xf32, #tpu.memory_space<vmem>>, vector<8x128xf32>,
    %c0_i32_8 = arith.constant 0 : i32
    %9 = arith.cmpi eq, %arg2, %c0_i32_8 : i32
    %10 = arith.extui %9 : i1 to i32
    %c0_i32_9 = arith.constant 0 : i32
    %11 = arith.cmpi ne, %10, %c0_i32_9 : i32
    scf.if %11 {
      %c0_10 = arith.constant 0 : index
      %c0_11 = arith.constant 0 : index
      %12 = vector.load %arg6[%c0_10, %c0_11] : memref<8x128xf32, #tpu.memory_space<vmem>>, vector<8x128xf32>
      %c0_12 = arith.constant 0 : index
      %c0_13 = arith.constant 0 : index
      %13 = vector.load %arg5[%c0_12, %c0_13] : memref<1x128xf32, #tpu.memory_space<vmem>>, vector<1x128xf32>
      %14 = vector.broadcast %13 : vector<1x128xf32> to vector<8x128xf32>
      %15 = arith.addf %12, %14 : vector<8x128xf32>
      %c0_14 = arith.constant 0 : index
      %c0_15 = arith.constant 0 : index
      %16 = vector.load %arg6[%c0_14, %c0_15] : memref<8x128xf32, #tpu.memory_space<vmem>>, vector<8x128xf32>
      tpu.vector_store %arg6[%c0_14, %c0_15], %15 {strides = array<i32>} : memref<8x128xf32, #tpu.memory_space<vmem>>, vector<8x128xf32>,
    } else {
    }
    return
  }
  func.func @transform_0(%arg0: i32, %arg1: i32, %arg2: i32) -> (i32, i32) {
    %c0_i32 = arith.constant 0 : i32
    return %arg0, %arg2 : i32, i32
  }
  func.func @transform_1(%arg0: i32, %arg1: i32, %arg2: i32) -> (i32, i32) {
    %c0_i32 = arith.constant 0 : i32
    return %arg2, %arg1 : i32, i32
  }
  func.func @transform_2(%arg0: i32, %arg1: i32, %arg2: i32) -> (i32, i32) {
    %c0_i32 = arith.constant 0 : i32
    %c0_i32_0 = arith.constant 0 : i32
    return %c0_i32, %arg1 : i32, i32
  }
  func.func @transform_3(%arg0: i32, %arg1: i32, %arg2: i32) -> (i32, i32) {
    %c0_i32 = arith.constant 0 : i32
    return %arg0, %arg1 : i32, i32
  }
}

</mosaic_0001>

<bundles_post_ra>
// kernel: linear_forward.1
= control target key start
LH: loop header
LB: loop body
LE: loop exit
PB: predicated region body
PF: predicated region fallthrough
CT: control target
= control target key end

     0   :  { %8 = vsyncpa [#allocation3], 0  ;;  %s341_s0 = inlined_call_operand.vmem [shape: f32[8,128], index: 0, kind: input, shape index: {}]   ;;  %s342_s1 = inlined_call_operand.hbm [shape: f32[128,128], index: 1, kind: input, shape index: {}]   ;;  %s343_s2 = inlined_call_operand.vmem [shape: f32[1,128], index: 2, kind: input, shape index: {}]   ;;  %s344_s3 = inlined_call_operand.hbm [shape: f32[8,128], index: 3, kind: output, shape index: {}]  }
   0x1   :  { %9 = vsyncpa [#allocation4], 0  ;;  %s284_s12 = smov [#allocation2]   ;;  %s236_s16 = scalar_lea.hbm %s342_s1, 2048 }
   0x2   :  { %s17_s13 = sshll.u32 %s284_s12, 4  ;;  %p237_p0 = scmp.ne.s32.totalorder %s342_s1, %s236_s16  ;;  %s18_s13 = int_to_ptr.vmem [resolvable:$true] %s17_s13 }
   0x3   :  { %p240_p1 = scmp.lt.u32.totalorder %s236_s16, %s342_s1 }
   0x5   :  { %p242_p2 = pnand %p240_p1, %p237_p0 }
   0x7   :  { %245 = shalt.err (!%p242_p2)
}
   0x8   :  { %s246_s21 = scalar_lea.vmem %s18_s13, 2048  ;;  %p251_p4 = scmp.lt.s32.totalorder %s18_s13, %s18_s13 }
   0x9   :  { %p247_p3 = scmp.ne.s32.totalorder %s18_s13, %s246_s21  ;;  %p252_p5 = scmp.lt.s32.totalorder %s246_s21, %s246_s21 }
   0xb   :  { %p253_p6 = por %p252_p5, %p251_p4 }
   0xd   :  { %p254_p7 = pnand %p253_p6, %p247_p3 }
   0xf   :  { %257 = shalt.err (!%p254_p7)
}
  0x10   :  { %s285_s22 = smov 128   ;;  %s286_s23 = smov 8  }
  0x11   :  { %23 = dma.hbm_to_vmem [thread:$0]  %s342_s1, 2048, %s18_s13, [#allocation3], %s285_s22, %s285_s22, %s286_s23  }
  0x12   :  { %280 = dma.done.wait [#allocation3], 2048  }
  0x13   :  { %281 = vsyncadd [#allocation3], 4294965248  ;;  %v287_v0 = vmov 0.0|0.0   ;;  %vm288_vm0 = vmmov 0   ;;  %v289_v1 = vmov 0.0   ;;  %v36_v2 = vld [vmem:[#allocation2] sm:$0xff] }
  0x14   :  { %205 = vmatprep.subr.bf16.mxu0 %v287_v0  ;;  %202 = vmatprep.mubr.msk.f32.mxu0 %vm288_vm0, %v289_v1  ;;  %v37_v3 = vld [vmem:[#allocation2 + $0x8] sm:$0xff]  ;;  %v38_v4 = vld [vmem:[#allocation2 + $0x10] sm:$0xff]  ;;  %v39_v6 = vld [vmem:[#allocation2 + $0x18] sm:$0xff]  ;;  %s290_s29 = smov [#allocation5]  }
  0x15   :  { %v206_v5 = vpack.c.bf16 %v37_v3, %v36_v2  ;;  %v209_v7 = vpack.c.bf16 %v39_v6, %v38_v4  ;;  %v40_v8 = vld [vmem:[#allocation2 + $0x20] sm:$0xff]  ;;  %v41_v9 = vld [vmem:[#allocation2 + $0x28] sm:$0xff]  ;;  %v42_v11 = vld [vmem:[#allocation2 + $0x30] sm:$0xff]  ;;  %s143_s30 = sshll.u32 %s290_s29, 4  ;;  %s144_s30 = int_to_ptr.vmem [resolvable:$true] %s143_s30 }
  0x16   :  { %v212_v10 = vpack.c.bf16 %v41_v9, %v40_v8  ;;  %v43_v12 = vld [vmem:[#allocation2 + $0x38] sm:$0xff]  ;;  %v44_v14 = vld [vmem:[#allocation2 + $0x40] sm:$0xff]  ;;  %v45_v15 = vld [vmem:[#allocation2 + $0x48] sm:$0xff]  ;;  %s258_s4 = scalar_lea.vmem %s144_s30, 128  ;;  %p263_p9 = scmp.lt.s32.totalorder %s144_s30, %s144_s30 }
  0x17   :  { %207 = vmatpush3.bf16.msra.mxu0 %v206_v5  ;;  %v215_v13 = vpack.c.bf16 %v43_v12, %v42_v11  ;;  %v218_v16 = vpack.c.bf16 %v45_v15, %v44_v14  ;;  %v46_v17 = vld [vmem:[#allocation2 + $0x50] sm:$0xff]  ;;  %v47_v18 = vld [vmem:[#allocation2 + $0x58] sm:$0xff]  ;;  %v48_v20 = vld [vmem:[#allocation2 + $0x60] sm:$0xff]  ;;  %p259_p8 = scmp.ne.s32.totalorder %s144_s30, %s258_s4  ;;  %p264_p10 = scmp.lt.s32.totalorder %s258_s4, %s258_s4 }
  0x18   :  { %208 = vmatprep.subr.bf16.mxu0 %v287_v0  ;;  %v221_v19 = vpack.c.bf16 %v47_v18, %v46_v17  ;;  %v49_v21 = vld [vmem:[#allocation2 + $0x68] sm:$0xff]  ;;  %v50_v23 = vld [vmem:[#allocation2 + $0x70] sm:$0xff]  ;;  %v51_v24 = vld [vmem:[#allocation2 + $0x78] sm:$0xff] }
  0x19   :  { %v224_v22 = vpack.c.bf16 %v49_v21, %v48_v20  ;;  %v227_v25 = vpack.c.bf16 %v51_v24, %v50_v23  ;;  %v35_v26 = vld [vmem:[%s341_s0] sm:$0xff]  ;;  %p265_p11 = por %p264_p10, %p263_p9 }
  0x1a   :  { %v152_v28 = vld [vmem:[%s343_s2] ss:$0 sm:$0xff] }
  0x1b   :  { %210 = vmatpush3.bf16.msra.mxu0 %v209_v7  ;;  %p266_p12 = pnand %p265_p11, %p259_p8 }
  0x1c   :  { %211 = vmatprep.subr.bf16.mxu0 %v287_v0 }
  0x1f   :  { %213 = vmatpush3.bf16.msra.mxu0 %v212_v10 }
  0x20   :  { %214 = vmatprep.subr.bf16.mxu0 %v287_v0 }
  0x23   :  { %216 = vmatpush3.bf16.msra.mxu0 %v215_v13 }
  0x24   :  { %217 = vmatprep.subr.bf16.mxu0 %v287_v0 }
  0x27   :  { %219 = vmatpush3.bf16.msra.mxu0 %v218_v16 }
  0x28   :  { %220 = vmatprep.subr.bf16.mxu0 %v287_v0 }
  0x2b   :  { %222 = vmatpush3.bf16.msra.mxu0 %v221_v19 }
  0x2c   :  { %223 = vmatprep.subr.bf16.mxu0 %v287_v0 }
  0x2f   :  { %225 = vmatpush3.bf16.msra.mxu0 %v224_v22 }
  0x30   :  { %226 = vmatprep.subr.bf16.mxu0 %v287_v0 }
  0x33   :  { %228 = vmatpush3.bf16.msra.mxu0 %v227_v25 }
  0x36   :  { %203 = vmatmul.mubr.f32.vlgmr.msra.gmra.mrb[0].mxu0 %v35_v26 }
 0x109   :  { %v118_v27 = vpop.f32.mrb[0].mxu0 }
 0x10a   :  { %v204_v29 = vpop.f32.mrb[1].mxu0  ;;  %v135_v30 = vadd.f32 %v152_v28, %v118_v27 }
 0x10c   :  { %136 = vst [vmem:[#allocation5] sm:$0xff] %v135_v30 }
 0x10d   :  { %269 = shalt.err (!%p266_p12)
}
 0x10e   :  { %s270_s6 = scalar_lea.hbm %s344_s3, 128 }
 0x10f   :  { %p271_p13 = scmp.ne.s32.totalorder %s344_s3, %s270_s6  ;;  %p274_p0 = scmp.lt.u32.totalorder %s270_s6, %s344_s3 }
 0x111   :  { %p276_p1 = pnand %p274_p0, %p271_p13 }
 0x113   :  { %279 = shalt.err (!%p276_p1)
}
 0x114   :  { %146 = dma.vmem_to_hbm [thread:$0]  %s144_s30, 128, %s344_s3, [#allocation4]  }
 0x115   :  { %282 = dma.done.wait [#allocation4], 128  }
 0x116   :  { %283 = vsyncadd [#allocation4], 4294967168 }
 0x117   :  { %150 = vsyncpa [#allocation3], 1 }
 0x118   :  { %151 = vsyncpa [#allocation4], 1 }

</bundles_post_ra>
